<compile_context>
chip_gen: v7x
topology: tpu7x:2x2x1
jax: 0.10.0
libtpu: 0.0.40
codegen_flags: <defaults>
</compile_context>

<pallas_src>
import functools

import jax
import jax.numpy as jnp
from jax.experimental import pallas as pl
from jax.experimental.pallas import tpu as pltpu


def _round_up(x, m):
    return (x + m - 1) // m * m


# Gate slab order inside the padded 4*Hp gate axis: [i, f, o, g]
# (PyTorch row order is [i, f, g, o]); sigmoids are contiguous.
_GATE_SLAB = (0, 1, 3, 2)  # pytorch gate index k -> slab position


# ---------------------------------------------------------------------------
# Kernel A: time-parallel input projection  gates_x = x @ W_ih_q^T + bias
# ---------------------------------------------------------------------------
def _input_proj_kernel(x_ref, w_ref, b_ref, out_ref):
    acc = jnp.dot(x_ref[...], w_ref[...], preferred_element_type=jnp.float32)
    out_ref[...] = (acc + b_ref[...]).astype(out_ref.dtype)


# ---------------------------------------------------------------------------
# Kernel B: sequential LSTM recurrence; Tb timesteps per grid step.
# h/c persist in VMEM scratch across grid steps; output h is fake-quantized.
# ---------------------------------------------------------------------------
def _lstm_recurrence_kernel(xproj_ref, whh_ref, scales_ref, y_ref,
                            h_ref, c_ref, *, hp, bp, tb, act_n_bits):
    blk = pl.program_id(0)

    @pl.when(blk == 0)
    def _():
        h_ref[...] = jnp.zeros_like(h_ref)
        c_ref[...] = jnp.zeros_like(c_ref)

    qmax = 2.0 ** (act_n_bits - 1) - 1.0
    s = scales_ref[0]        # activation scale (SMEM scalar)
    inv_s = scales_ref[1]    # precomputed reciprocal (no per-element divide)

    # TODO(synk): on v6e/v7x this could drive the MXU explicitly
    # (matmul_push_rhs once for the loop-invariant W_hh, matmul_acc_lhs per
    # step) to avoid re-pushing the RHS; jnp.dot kept for portability.
    def step(t, carry):
        r0 = pl.multiple_of(t * bp, bp)
        gx = xproj_ref[pl.ds(r0, bp), :].astype(jnp.float32)
        gates = gx + jnp.dot(h_ref[...].astype(jnp.bfloat16), whh_ref[...],
                             preferred_element_type=jnp.float32)
        # slab order [i, f, o, g]: one sigmoid over the 3 contiguous gates.
        sig = jax.nn.sigmoid(gates[:, :3 * hp])
        i_g = sig[:, 0 * hp:1 * hp]
        f_g = sig[:, 1 * hp:2 * hp]
        o_g = sig[:, 2 * hp:3 * hp]
        g_g = jnp.tanh(gates[:, 3 * hp:])

        c_new = f_g * c_ref[...] + i_g * g_g
        h_new = o_g * jnp.tanh(c_new)
        c_ref[...] = c_new
        h_ref[...] = h_new

        # Activation fake quantization (per-tensor symmetric).
        y_ref[pl.ds(r0, bp), :] = (
            jnp.clip(jnp.round(h_new * inv_s), -qmax, qmax) * s
        ).astype(y_ref.dtype)
        return carry

    jax.lax.fori_loop(0, tb, step, 0, unroll=True)


# ---------------------------------------------------------------------------
# Wrapper-side helpers (weight fake-quant hoisted out of the kernels).
# ---------------------------------------------------------------------------
def _fake_quant_weight(w, n_bits):
    # TODO(synk): get_weight_quantizer was not provided; a standard LSQ-style
    # symmetric per-output-row quantizer with max-abs scale init is used.
    qmax = 2.0 ** (n_bits - 1) - 1.0
    s = jnp.maximum(jnp.max(jnp.abs(w), axis=1, keepdims=True) / qmax, 1e-8)
    return jnp.clip(jnp.round(w / s), -qmax, qmax) * s


def _pad_gatewise_transposed(w_q, h, hp, kin, kin_p):
    """(4H, kin) -> (kin_p, 4*Hp) bf16; pytorch gate k lands in slab _GATE_SLAB[k]."""
    wt = w_q.T  # (kin, 4H)
    out = jnp.zeros((kin_p, 4 * hp), jnp.float32)
    for k in range(4):
        p = _GATE_SLAB[k]
        out = out.at[:kin, p * hp:p * hp + h].set(wt[:, k * h:(k + 1) * h])
    return out.astype(jnp.bfloat16)


def _pad_gatewise_bias(b, h, hp):
    out = jnp.zeros((1, 4 * hp), jnp.float32)
    for k in range(4):
        p = _GATE_SLAB[k]
        out = out.at[0, p * hp:p * hp + h].set(b[k * h:(k + 1) * h])
    return out


def _run_recurrence(gates, w_hh_t, scales, *, Tp, Tb, Bp, Hp, G4,
                    act_n_bits, single_buffer_whh):
    Rp = Tp * Bp
    whh_kwargs = {}
    whh_bufs = 2
    if single_buffer_whh:
        # Constant block index -> double-buffering buys nothing; halve the
        # resident weight VMEM (matters at large H on v7x's 64 MiB VMEM).
        whh_kwargs = dict(pipeline_mode=pl.Buffered(1))
        whh_bufs = 1

    footprint = (whh_bufs * Hp * G4 * 2       # W_hh (bf16)
                 + 2 * Tb * Bp * G4 * 2       # xproj, double-buffered (bf16)
                 + 2 * Tb * Bp * Hp * 4       # y, double-buffered (f32)
                 + 2 * Bp * Hp * 4)           # h/c scratch (f32)
    vmem_limit = int(min(max(2 * footprint, 8 << 20), 64 << 20))

    kernel = functools.partial(_lstm_recurrence_kernel, hp=Hp, bp=Bp, tb=Tb,
                               act_n_bits=act_n_bits)
    return pl.pallas_call(
        kernel,
        out_shape=jax.ShapeDtypeStruct((Rp, Hp), jnp.float32),
        grid=(Tp // Tb,),
        in_specs=[
            pl.BlockSpec((Tb * Bp, G4), lambda b: (b, 0)),
            pl.BlockSpec((Hp, G4), lambda b: (0, 0), **whh_kwargs),
            pl.BlockSpec(memory_space=pltpu.MemorySpace.SMEM),
        ],
        out_specs=pl.BlockSpec((Tb * Bp, Hp), lambda b: (b, 0)),
        scratch_shapes=[
            pltpu.VMEM((Bp, Hp), jnp.float32),   # h state
            pltpu.VMEM((Bp, Hp), jnp.float32),   # c state
        ],
        compiler_params=pltpu.CompilerParams(
            dimension_semantics=("arbitrary",),
            vmem_limit_bytes=vmem_limit),
    )(gates, w_hh_t, scales)


def lstmq_forward(x, w_ih, w_hh, b_ih, b_hh, *,
                  weight_n_bits=8, act_n_bits=8, act_scale=1.0 / 127.0):
    """LSTMQ.forward for a single-layer, unidirectional, batch_first=False LSTM.

    x: (T, B, input_size); w_ih: (4H, input_size); w_hh: (4H, H);
    b_ih, b_hh: (4H,).  Returns the fake-quantized output sequence (T, B, H)
    (the module wraps it in a 1-element list)."""
    T, B, I = x.shape
    H4, H = w_hh.shape
    assert H4 == 4 * H and w_ih.shape == (4 * H, I)

    # TODO(synk): multi-layer / bidirectional / proj_size LSTM variants of
    # _VF.lstm are not implemented here.

    f32, bf16 = jnp.float32, jnp.bfloat16
    Hp = _round_up(H, 128)      # lane-dense hidden slab per gate
    Ip = _round_up(I, 128)      # lane-dense contraction dim
    Bp = _round_up(B, 8)        # sublane-aligned batch
    G4 = 4 * Hp

    # ---- timestep blocking for the sequential recurrence --------------------
    Tb = min(T, 16)             # timesteps per Kernel B grid step
    Tp = _round_up(T, Tb)       # padded steps (extra steps computed, discarded)
    Rp = Tp * Bp                # flattened row count; row = t * Bp + b

    # ---- weight fake quantization: once per forward, grid-invariant --------
    w_ih_q = _fake_quant_weight(w_ih.astype(f32), weight_n_bits)
    w_hh_q = _fake_quant_weight(w_hh.astype(f32), weight_n_bits)

    # ---- MXU-friendly (K, N) layouts, zero-padded, bf16, slabs [i,f,o,g] ---
    w_ih_t = _pad_gatewise_transposed(w_ih_q, H, Hp, I, Ip)       # (Ip, 4Hp)
    w_hh_t = _pad_gatewise_transposed(w_hh_q, H, Hp, H, Hp)       # (Hp, 4Hp)
    bias = _pad_gatewise_bias((b_ih + b_hh).astype(f32), H, Hp)   # (1, 4Hp)

    # ---- pad input straight into a bf16 (Rp, Ip) slab (no f32 round trip) --
    x2d = jnp.pad(x.astype(bf16),
                  ((0, Tp - T), (0, Bp - B), (0, Ip - I))).reshape(Rp, Ip)

    # ---------------- Kernel A: gates_x = x @ W_ih_q^T + bias ----------------
    # Row tile divides Rp exactly -> output is consumed by Kernel B with no
    # intermediate slice/reshape copy.
    TM = Tb * Bp
    while TM * 2 <= 512 and Rp % (TM * 2) == 0:
        TM *= 2
    TN = min(G4, 512)           # G4 is a multiple of 512

    def _a_footprint(tm, tn):
        return 2 * (tm * Ip * 2 + Ip * tn * 2 + tm * tn * 2) + 2 * tn * 4

    while TN > 128 and _a_footprint(TM, TN) > (24 << 20):
        TN //= 2
    vmem_a = int(min(max(2 * _a_footprint(TM, TN), 8 << 20), 64 << 20))

    gates = pl.pallas_call(
        _input_proj_kernel,
        out_shape=jax.ShapeDtypeStruct((Rp, G4), bf16),   # bf16: halves traffic
        grid=(Rp // TM, G4 // TN),
        in_specs=[
            pl.BlockSpec((TM, Ip), lambda m, n: (m, 0)),
            pl.BlockSpec((Ip, TN), lambda m, n: (0, n)),
            pl.BlockSpec((1, TN), lambda m, n: (0, n)),
        ],
        out_specs=pl.BlockSpec((TM, TN), lambda m, n: (m, n)),
        compiler_params=pltpu.CompilerParams(
            dimension_semantics=("parallel", "parallel"),
            vmem_limit_bytes=vmem_a),
    )(x2d, w_ih_t, bias)

    # -------------- Kernel B: sequential recurrence over time ----------------
    # TODO(synk): the time axis is inherently sequential (single TensorCore);
    # on v7x, independent sequences/layers/directions should be added as a
    # leading "parallel" grid axis to occupy the second core.
    scales = jnp.array([act_scale, 1.0 / act_scale], dtype=f32)
    try:
        y_flat = _run_recurrence(gates, w_hh_t, scales, Tp=Tp, Tb=Tb, Bp=Bp,
                                 Hp=Hp, G4=G4, act_n_bits=act_n_bits,
                                 single_buffer_whh=True)
    except Exception:
        # Fallback if pipeline_mode=pl.Buffered(1) is rejected by this
        # jax/Mosaic version; identical semantics, default double-buffering.
        y_flat = _run_recurrence(gates, w_hh_t, scales, Tp=Tp, Tb=Tb, Bp=Bp,
                                 Hp=Hp, G4=G4, act_n_bits=act_n_bits,
                                 single_buffer_whh=False)

    # (Rp, Hp) -> (Tp, Bp, Hp) only splits the leading dim (free); the slice
    # trims time/batch/hidden padding from the small final output.
    return y_flat.reshape(Tp, Bp, Hp)[:T, :B, :H]


if __name__ == "__main__":
    key = jax.random.PRNGKey(0)
    kx, k1, k2, k3, k4 = jax.random.split(key, 5)

    # Small LSTM config: seq=8, batch=2, input_size=16, hidden_size=32.
    T, B, I, H = 8, 2, 16, 32

    x = jax.random.normal(kx, (T, B, I), dtype=jnp.float32)
    w_ih = 0.1 * jax.random.normal(k1, (4 * H, I), dtype=jnp.float32)
    w_hh = 0.1 * jax.random.normal(k2, (4 * H, H), dtype=jnp.float32)
    b_ih = 0.01 * jax.random.normal(k3, (4 * H,), dtype=jnp.float32)
    b_hh = 0.01 * jax.random.normal(k4, (4 * H,), dtype=jnp.float32)

    y = lstmq_forward(x, w_ih, w_hh, b_ih, b_hh,
                      weight_n_bits=8, act_n_bits=8)
    y = jax.block_until_ready(y)

    assert y.shape == (T, B, H), y.shape
    assert bool(jnp.all(jnp.isfinite(y)))
    print("KERNEL_OK")
</pallas_src>

<mosaic_0001>
module attributes {stable_mosaic.version = 11 : i64} {
  func.func @_input_proj_kernel(%arg0: i32, %arg1: i32, %arg2: memref<64x128xbf16, #tpu.memory_space<vmem>>, %arg3: memref<128x512xbf16, #tpu.memory_space<vmem>>, %arg4: memref<1x512xf32, #tpu.memory_space<vmem>>, %arg5: memref<64x512xbf16, #tpu.memory_space<vmem>>) attributes {dimension_semantics = [#tpu.dimension_semantics<parallel>, #tpu.dimension_semantics<parallel>], iteration_bounds = array<i64: 1, 1>, scalar_prefetch = 0 : i64, scratch_operands = 0 : i64, tpu.core_type = #tpu.core_type<tc>, window_params = [{transform_indices = @transform_0, window_bounds = array<i64: 64, 128>}, {transform_indices = @transform_1, window_bounds = array<i64: 128, 512>}, {transform_indices = @transform_2, window_bounds = array<i64: 1, 512>}, {transform_indices = @transform_3, window_bounds = array<i64: 64, 512>}]} {
    %c0 = arith.constant 0 : index
    %c0_0 = arith.constant 0 : index
    %0 = vector.load %arg2[%c0, %c0_0] : memref<64x128xbf16, #tpu.memory_space<vmem>>, vector<64x128xbf16>
    %c0_1 = arith.constant 0 : index
    %c0_2 = arith.constant 0 : index
    %1 = vector.load %arg3[%c0_1, %c0_2] : memref<128x512xbf16, #tpu.memory_space<vmem>>, vector<128x512xbf16>
    %cst = arith.constant dense<0.000000e+00> : vector<64x512xf32>
    %2 = tpu.matmul %0, %1, %cst {dimension_numbers = #tpu.dot_dimension_numbers<[1], [0], [0], [1], [0, 0, 1, 1], [], []>} : vector<64x128xbf16>, vector<128x512xbf16>, vector<64x512xf32> -> vector<64x512xf32>
    %c0_3 = arith.constant 0 : index
    %c0_4 = arith.constant 0 : index
    %3 = vector.load %arg4[%c0_3, %c0_4] : memref<1x512xf32, #tpu.memory_space<vmem>>, vector<1x512xf32>
    %4 = vector.broadcast %3 : vector<1x512xf32> to vector<64x512xf32>
    %5 = arith.addf %2, %4 : vector<64x512xf32>
    %6 = arith.truncf %5 : vector<64x512xf32> to vector<64x512xbf16>
    %c0_5 = arith.constant 0 : index
    %c0_6 = arith.constant 0 : index
    %7 = vector.load %arg5[%c0_5, %c0_6] : memref<64x512xbf16, #tpu.memory_space<vmem>>, vector<64x512xbf16>
    tpu.vector_store %arg5[%c0_5, %c0_6], %6 {strides = array<i32>} : memref<64x512xbf16, #tpu.memory_space<vmem>>, vector<64x512xbf16>,
    return
  }
  func.func @transform_0(%arg0: i32, %arg1: i32) -> (i32, i32) {
    %c0_i32 = arith.constant 0 : i32
    %c0_i32_0 = arith.constant 0 : i32
    return %arg0, %c0_i32 : i32, i32
  }
  func.func @transform_1(%arg0: i32, %arg1: i32) -> (i32, i32) {
    %c0_i32 = arith.constant 0 : i32
    %c0_i32_0 = arith.constant 0 : i32
    return %c0_i32, %arg1 : i32, i32
  }
  func.func @transform_2(%arg0: i32, %arg1: i32) -> (i32, i32) {
    %c0_i32 = arith.constant 0 : i32
    %c0_i32_0 = arith.constant 0 : i32
    return %c0_i32, %arg1 : i32, i32
  }
  func.func @transform_3(%arg0: i32, %arg1: i32) -> (i32, i32) {
    %c0_i32 = arith.constant 0 : i32
    return %arg0, %arg1 : i32, i32
  }
}

</mosaic_0001>

<bundles_post_ra>
// kernel: tpu_custom_call.1
= control target key start
LH: loop header
LB: loop body
LE: loop exit
PB: predicated region body
PF: predicated region fallthrough
CT: control target
= control target key end

     0   :  { %8 = vsyncpa [#allocation3], 0  ;;  %s887_s0 = inlined_call_operand.hbm [shape: bf16[64,128], index: 0, kind: input, shape index: {}]   ;;  %s888_s1 = inlined_call_operand.hbm [shape: bf16[128,512], index: 1, kind: input, shape index: {}]   ;;  %s889_s2 = inlined_call_operand.vmem [shape: f32[1,512], index: 2, kind: input, shape index: {}]   ;;  %s890_s3 = inlined_call_operand.hbm [shape: bf16[64,512], index: 3, kind: output, shape index: {}]  }
   0x1   :  { %9 = vsyncpa [#allocation6], 0 }
   0x2   :  { %10 = vsyncpa [#allocation4], 0  ;;  %s766_s12 = smov [#allocation2]   ;;  %s694_s16 = scalar_lea.hbm %s887_s0, 512 }
   0x3   :  { %s16_s13 = sshll.u32 %s766_s12, 4  ;;  %p695_p0 = scmp.ne.s32.totalorder %s887_s0, %s694_s16  ;;  %s17_s13 = int_to_ptr.vmem [resolvable:$true] %s16_s13 }
   0x4   :  { %p698_p1 = scmp.lt.u32.totalorder %s694_s16, %s887_s0 }
   0x6   :  { %p700_p2 = pnand %p698_p1, %p695_p0 }
   0x8   :  { %703 = shalt.err (!%p700_p2)
}
   0x9   :  { %s704_s21 = scalar_lea.vmem %s17_s13, 512  ;;  %p709_p4 = scmp.lt.s32.totalorder %s17_s13, %s17_s13 }
   0xa   :  { %p705_p3 = scmp.ne.s32.totalorder %s17_s13, %s704_s21  ;;  %p710_p5 = scmp.lt.s32.totalorder %s704_s21, %s704_s21 }
   0xc   :  { %p711_p6 = por %p710_p5, %p709_p4 }
   0xe   :  { %p712_p7 = pnand %p711_p6, %p705_p3 }
  0x10   :  { %715 = shalt.err (!%p712_p7)
}
  0x11   :  { %s767_s22 = smov 64   ;;  %s768_s23 = smov 4  }
  0x12   :  { %22 = dma.hbm_to_vmem [thread:$0]  %s887_s0, 512, %s17_s13, [#allocation3], %s767_s22, %s767_s22, %s768_s23  }
  0x13   :  { %s769_s26 = smov [#allocation5]   ;;  %s716_s30 = scalar_lea.hbm %s888_s1, 4096 }
  0x14   :  { %s28_s27 = sshll.u32 %s769_s26, 4  ;;  %p717_p8 = scmp.ne.s32.totalorder %s888_s1, %s716_s30  ;;  %s29_s27 = int_to_ptr.vmem [resolvable:$true] %s28_s27 }
  0x15   :  { %p720_p9 = scmp.lt.u32.totalorder %s716_s30, %s888_s1 }
  0x17   :  { %p722_p10 = pnand %p720_p9, %p717_p8 }
  0x19   :  { %725 = shalt.err (!%p722_p10)
}
  0x1a   :  { %s726_s8 = scalar_lea.vmem %s29_s27, 4096  ;;  %p731_p12 = scmp.lt.s32.totalorder %s29_s27, %s29_s27 }
  0x1b   :  { %p727_p11 = scmp.ne.s32.totalorder %s29_s27, %s726_s8  ;;  %p732_p13 = scmp.lt.s32.totalorder %s726_s8, %s726_s8 }
  0x1d   :  { %p733_p0 = por %p732_p13, %p731_p12 }
  0x1f   :  { %p734_p1 = pnand %p733_p0, %p727_p11 }
  0x21   :  { %737 = shalt.err (!%p734_p1)
}
  0x22   :  { %s770_s0 = smov 256   ;;  %s771_s9 = smov 16  }
  0x23   :  { %34 = dma.hbm_to_vmem [thread:$0]  %s888_s1, 4096, %s29_s27, [#allocation6], %s770_s0, %s770_s0, %s771_s9  }
  0x24   :  { %760 = dma.done.wait [#allocation3], 512  }
  0x25   :  { %761 = vsyncadd [#allocation3], 4294966784 }
  0x26   :  { %762 = dma.done.wait [#allocation6], 4096  }
  0x27   :  { %763 = vsyncadd [#allocation6], 4294963200  ;;  %v772_v0 = vmov 0   ;;  %v642_v1 = vld [vmem:[#allocation5 + $0x4] ss:$16 sps:$4 sm:$0xff]   ;;  %v691_v34 = vld [vmem:[#allocation2 + $0x8] sm:$0xff]   ;;  %v86_v37 = vlaneseq }
  0x28   :  { %322 = vmatprep.mubr.bf16.mxu0 %v772_v0  ;;  %395 = vmatprep.mubr.bf16.mxu1 %v772_v0  ;;  %v644_v2 = vld [vmem:[#allocation5 + $0xc] ss:$16 sps:$4 sm:$0xff]   ;;  %v646_v3 = vld [vmem:[#allocation5] ss:$16 sps:$4 sm:$0xff]   ;;  %v647_v4 = vld [vmem:[#allocation5 + $0x8] ss:$16 sps:$4 sm:$0xff]  }
  0x29   :  { %290 = vmatprep.subr.bf16.mxu0 %v642_v1  ;;  %363 = vmatprep.subr.bf16.mxu1 %v644_v2  ;;  %v648_v5 = vld [vmem:[#allocation5 + $0x24] ss:$16 sps:$4 sm:$0xff]   ;;  %v650_v6 = vld [vmem:[#allocation5 + $0x2c] ss:$16 sps:$4 sm:$0xff]   ;;  %v652_v7 = vld [vmem:[#allocation5 + $0x20] ss:$16 sps:$4 sm:$0xff]  }
  0x2a   :  { %291 = vmatpush1.bf16.msra.mxu0 %v646_v3  ;;  %364 = vmatpush1.bf16.msra.mxu1 %v647_v4  ;;  %v653_v8 = vld [vmem:[#allocation5 + $0x28] ss:$16 sps:$4 sm:$0xff]   ;;  %v654_v9 = vld [vmem:[#allocation5 + $0x44] ss:$16 sps:$4 sm:$0xff]   ;;  %v656_v10 = vld [vmem:[#allocation5 + $0x4c] ss:$16 sps:$4 sm:$0xff]  }
  0x2b   :  { %292 = vmatprep.subr.bf16.mxu0 %v648_v5  ;;  %365 = vmatprep.subr.bf16.mxu1 %v650_v6  ;;  %v658_v11 = vld [vmem:[#allocation5 + $0x40] ss:$16 sps:$4 sm:$0xff]   ;;  %v659_v12 = vld [vmem:[#allocation5 + $0x48] ss:$16 sps:$4 sm:$0xff]   ;;  %v660_v13 = vld [vmem:[#allocation5 + $0x64] ss:$16 sps:$4 sm:$0xff]  }
  0x2c   :  { %v662_v14 = vld [vmem:[#allocation5 + $0x6c] ss:$16 sps:$4 sm:$0xff]   ;;  %v664_v15 = vld [vmem:[#allocation5 + $0x60] ss:$16 sps:$4 sm:$0xff]   ;;  %v665_v16 = vld [vmem:[#allocation5 + $0x68] ss:$16 sps:$4 sm:$0xff]  }
  0x2d   :  { %v666_v17 = vld [vmem:[#allocation5 + $0x84] ss:$16 sps:$4 sm:$0xff]   ;;  %v668_v18 = vld [vmem:[#allocation5 + $0x8c] ss:$16 sps:$4 sm:$0xff]   ;;  %v670_v19 = vld [vmem:[#allocation5 + $0x80] ss:$16 sps:$4 sm:$0xff]  }
  0x2e   :  { %293 = vmatpush1.bf16.msra.mxu0 %v652_v7  ;;  %366 = vmatpush1.bf16.msra.mxu1 %v653_v8  ;;  %v671_v20 = vld [vmem:[#allocation5 + $0x88] ss:$16 sps:$4 sm:$0xff]   ;;  %v672_v21 = vld [vmem:[#allocation5 + $0xa4] ss:$16 sps:$4 sm:$0xff]   ;;  %v674_v22 = vld [vmem:[#allocation5 + $0xac] ss:$16 sps:$4 sm:$0xff]  }
  0x2f   :  { %294 = vmatprep.subr.bf16.mxu0 %v654_v9  ;;  %367 = vmatprep.subr.bf16.mxu1 %v656_v10  ;;  %v676_v23 = vld [vmem:[#allocation5 + $0xa0] ss:$16 sps:$4 sm:$0xff]   ;;  %v677_v24 = vld [vmem:[#allocation5 + $0xa8] ss:$16 sps:$4 sm:$0xff]   ;;  %v678_v25 = vld [vmem:[#allocation5 + $0xc4] ss:$16 sps:$4 sm:$0xff]  }
  0x30   :  { %v680_v26 = vld [vmem:[#allocation5 + $0xcc] ss:$16 sps:$4 sm:$0xff]   ;;  %v682_v27 = vld [vmem:[#allocation5 + $0xc0] ss:$16 sps:$4 sm:$0xff]   ;;  %v683_v28 = vld [vmem:[#allocation5 + $0xc8] ss:$16 sps:$4 sm:$0xff]  }
  0x31   :  { %v684_v29 = vld [vmem:[#allocation5 + $0xe4] ss:$16 sps:$4 sm:$0xff]   ;;  %v686_v30 = vld [vmem:[#allocation5 + $0xec] ss:$16 sps:$4 sm:$0xff]   ;;  %v688_v31 = vld [vmem:[#allocation5 + $0xe0] ss:$16 sps:$4 sm:$0xff]  }
  0x32   :  { %295 = vmatpush1.bf16.msra.mxu0 %v658_v11  ;;  %368 = vmatpush1.bf16.msra.mxu1 %v659_v12  ;;  %v689_v32 = vld [vmem:[#allocation5 + $0xe8] ss:$16 sps:$4 sm:$0xff]   ;;  %v690_v33 = vld [vmem:[#allocation2] sm:$0xff]   ;;  %v692_v35 = vld [vmem:[#allocation2 + $0x10] sm:$0xff]   ;;  %v87_v38 = vshrl.u32 %v86_v37, 7 }
  0x33   :  { %296 = vmatprep.subr.bf16.mxu0 %v660_v13  ;;  %369 = vmatprep.subr.bf16.mxu1 %v662_v14  ;;  %v693_v36 = vld [vmem:[#allocation2 + $0x18] sm:$0xff]   ;;  %v84_v41 = vld [vmem:[%s889_s2] sm:$0xf]  ;;  %s773_s2 = smov [#allocation7]  }
  0x34   :  { %v88_v39 = vsub.s32 0, %v87_v38  ;;  %v96_v40 = vsub.s32 2, %v87_v38  ;;  %v92_v42 = vsub.s32 1, %v87_v38  ;;  %v100_v43 = vsub.s32 3, %v87_v38  ;;  %s553_s13 = sshll.u32 %s773_s2, 4  ;;  %s554_s13 = int_to_ptr.vmem [resolvable:$true] %s553_s13 }
  0x35   :  { %s738_s14 = scalar_lea.vmem %s554_s13, 2048  ;;  %p743_p3 = scmp.lt.s32.totalorder %s554_s13, %s554_s13 }
  0x36   :  { %297 = vmatpush1.bf16.msra.mxu0 %v664_v15  ;;  %370 = vmatpush1.bf16.msra.mxu1 %v665_v16  ;;  %v832_v44 = vrot.slane %v84_v41, %v88_v39  ;;  %v834_v45 = vrot.slane %v84_v41, %v96_v40  ;;  %v836_v46 = vrot.slane %v84_v41, %v92_v42  ;;  %p739_p2 = scmp.ne.s32.totalorder %s554_s13, %s738_s14  ;;  %p744_p4 = scmp.lt.s32.totalorder %s738_s14, %s738_s14 }
  0x37   :  { %298 = vmatprep.subr.bf16.mxu0 %v666_v17  ;;  %371 = vmatprep.subr.bf16.mxu1 %v668_v18  ;;  %v838_v47 = vrot.slane %v84_v41, %v100_v43 }
  0x38   :  { %p745_p5 = por %p744_p4, %p743_p3 }
  0x3a   :  { %299 = vmatpush1.bf16.msra.mxu0 %v670_v19  ;;  %372 = vmatpush1.bf16.msra.mxu1 %v671_v20  ;;  %p746_p6 = pnand %p745_p5, %p739_p2 }
  0x3b   :  { %300 = vmatprep.subr.bf16.mxu0 %v672_v21  ;;  %373 = vmatprep.subr.bf16.mxu1 %v674_v22 }
  0x3e   :  { %301 = vmatpush1.bf16.msra.mxu0 %v676_v23  ;;  %374 = vmatpush1.bf16.msra.mxu1 %v677_v24 }
  0x3f   :  { %302 = vmatprep.subr.bf16.mxu0 %v678_v25  ;;  %375 = vmatprep.subr.bf16.mxu1 %v680_v26 }
  0x42   :  { %303 = vmatpush1.bf16.msra.mxu0 %v682_v27  ;;  %376 = vmatpush1.bf16.msra.mxu1 %v683_v28 }
  0x43   :  { %304 = vmatprep.subr.bf16.mxu0 %v684_v29  ;;  %377 = vmatprep.subr.bf16.mxu1 %v686_v30 }
  0x46   :  { %305 = vmatpush1.bf16.msra.mxu0 %v688_v31  ;;  %378 = vmatpush1.bf16.msra.mxu1 %v689_v32 }
  0x49   :  { %323 = vmatmul.mubr.bf16.vlgmr.msra.gmra.mrb[0].mxu0 %v690_v33  ;;  %396 = vmatmul.mubr.bf16.vlgmr.msra.gmra.mrb[0].mxu1 %v690_v33 }
  0x4a   :  { %332 = vmatprep.mubr.bf16.mxu0 %v772_v0  ;;  %405 = vmatprep.mubr.bf16.mxu1 %v772_v0 }
  0x51   :  { %333 = vmatmul.mubr.bf16.gmra.mrb[4].mxu0 %v691_v34  ;;  %406 = vmatmul.mubr.bf16.gmra.mrb[4].mxu1 %v691_v34 }
  0x52   :  { %342 = vmatprep.mubr.bf16.mxu0 %v772_v0  ;;  %415 = vmatprep.mubr.bf16.mxu1 %v772_v0 }
  0x59   :  { %343 = vmatmul.mubr.bf16.gmra.mrb[8].mxu0 %v692_v35  ;;  %416 = vmatmul.mubr.bf16.gmra.mrb[8].mxu1 %v692_v35 }
  0x5a   :  { %352 = vmatprep.mubr.bf16.mxu0 %v772_v0  ;;  %425 = vmatprep.mubr.bf16.mxu1 %v772_v0 }
  0x61   :  { %353 = vmatmul.mubr.bf16.gmra.mrb[12].mxu0 %v693_v36  ;;  %426 = vmatmul.mubr.bf16.gmra.mrb[12].mxu1 %v693_v36 }
 0x11c   :  { %v324_v48 = vpop.f32.mrb[0].mxu0  ;;  %v397_v49 = vpop.f32.mrb[0].mxu1 }
 0x11d   :  { %v325_v50 = vadd.f32 %v324_v48, %v832_v44  ;;  %v398_v51 = vadd.f32 %v397_v49, %v834_v45  ;;  %v326_v52 = vpop.f32.mrb[1].mxu0  ;;  %v399_v53 = vpop.f32.mrb[1].mxu1 }
 0x11e   :  { %v327_v54 = vadd.f32 %v326_v52, %v836_v46  ;;  %v400_v55 = vadd.f32 %v399_v53, %v838_v47  ;;  %v328_v56 = vpop.f32.mrb[2].mxu0  ;;  %v401_v57 = vpop.f32.mrb[2].mxu1 }
 0x11f   :  { %v329_v58 = vadd.f32 %v328_v56, %v832_v44  ;;  %v402_v59 = vadd.f32 %v401_v57, %v834_v45  ;;  %v330_v60 = vpop.f32.mrb[3].mxu0  ;;  %v403_v61 = vpop.f32.mrb[3].mxu1 }
 0x120   :  { %v618_v62 = vpack.c.bf16 %v327_v54, %v325_v50  ;;  %v619_v63 = vpack.c.bf16 %v400_v55, %v398_v51  ;;  %v331_v0 = vadd.f32 %v330_v60, %v836_v46  ;;  %v404_v1 = vadd.f32 %v403_v61, %v838_v47 }
 0x122   :  { %532 = vst [vmem:[#allocation7] sm:$0xff] %v618_v62  ;;  %533 = vst [vmem:[#allocation7 + $0x8] sm:$0xff] %v619_v63  ;;  %v620_v2 = vpack.c.bf16 %v331_v0, %v329_v58  ;;  %v621_v3 = vpack.c.bf16 %v404_v1, %v402_v59 }
 0x124   :  { %534 = vst [vmem:[#allocation7 + $0x10] sm:$0xff] %v620_v2  ;;  %535 = vst [vmem:[#allocation7 + $0x18] sm:$0xff] %v621_v3  ;;  %v334_v4 = vpop.f32.mrb[4].mxu0  ;;  %v407_v5 = vpop.f32.mrb[4].mxu1 }
 0x125   :  { %v335_v6 = vadd.f32 %v334_v4, %v832_v44  ;;  %v408_v7 = vadd.f32 %v407_v5, %v834_v45  ;;  %v336_v8 = vpop.f32.mrb[5].mxu0  ;;  %v409_v9 = vpop.f32.mrb[5].mxu1 }
 0x126   :  { %v337_v10 = vadd.f32 %v336_v8, %v836_v46  ;;  %v410_v11 = vadd.f32 %v409_v9, %v838_v47  ;;  %v338_v12 = vpop.f32.mrb[6].mxu0  ;;  %v411_v13 = vpop.f32.mrb[6].mxu1 }
 0x127   :  { %v339_v14 = vadd.f32 %v338_v12, %v832_v44  ;;  %v412_v15 = vadd.f32 %v411_v13, %v834_v45  ;;  %v340_v16 = vpop.f32.mrb[7].mxu0  ;;  %v413_v17 = vpop.f32.mrb[7].mxu1 }
 0x128   :  { %v622_v18 = vpack.c.bf16 %v337_v10, %v335_v6  ;;  %v623_v19 = vpack.c.bf16 %v410_v11, %v408_v7  ;;  %v341_v20 = vadd.f32 %v340_v16, %v836_v46  ;;  %v414_v21 = vadd.f32 %v413_v17, %v838_v47 }
 0x12a   :  { %536 = vst [vmem:[#allocation7 + $0x20] sm:$0xff] %v622_v18  ;;  %537 = vst [vmem:[#allocation7 + $0x28] sm:$0xff] %v623_v19  ;;  %v624_v22 = vpack.c.bf16 %v341_v20, %v339_v14  ;;  %v625_v23 = vpack.c.bf16 %v414_v21, %v412_v15 }
 0x12c   :  { %538 = vst [vmem:[#allocation7 + $0x30] sm:$0xff] %v624_v22  ;;  %539 = vst [vmem:[#allocation7 + $0x38] sm:$0xff] %v625_v23  ;;  %v344_v24 = vpop.f32.mrb[8].mxu0  ;;  %v417_v25 = vpop.f32.mrb[8].mxu1 }
 0x12d   :  { %v345_v26 = vadd.f32 %v344_v24, %v832_v44  ;;  %v418_v27 = vadd.f32 %v417_v25, %v834_v45  ;;  %v346_v28 = vpop.f32.mrb[9].mxu0  ;;  %v419_v29 = vpop.f32.mrb[9].mxu1 }
 0x12e   :  { %v347_v30 = vadd.f32 %v346_v28, %v836_v46  ;;  %v420_v31 = vadd.f32 %v419_v29, %v838_v47  ;;  %v348_v32 = vpop.f32.mrb[10].mxu0  ;;  %v421_v33 = vpop.f32.mrb[10].mxu1 }
 0x12f   :  { %v349_v34 = vadd.f32 %v348_v32, %v832_v44  ;;  %v422_v35 = vadd.f32 %v421_v33, %v834_v45  ;;  %v350_v36 = vpop.f32.mrb[11].mxu0  ;;  %v423_v37 = vpop.f32.mrb[11].mxu1 }
 0x130   :  { %v626_v38 = vpack.c.bf16 %v347_v30, %v345_v26  ;;  %v627_v39 = vpack.c.bf16 %v420_v31, %v418_v27  ;;  %v351_v40 = vadd.f32 %v350_v36, %v836_v46  ;;  %v424_v41 = vadd.f32 %v423_v37, %v838_v47 }
 0x132   :  { %540 = vst [vmem:[#allocation7 + $0x40] sm:$0xff] %v626_v38  ;;  %541 = vst [vmem:[#allocation7 + $0x48] sm:$0xff] %v627_v39  ;;  %v628_v42 = vpack.c.bf16 %v351_v40, %v349_v34  ;;  %v629_v43 = vpack.c.bf16 %v424_v41, %v422_v35 }
 0x134   :  { %542 = vst [vmem:[#allocation7 + $0x50] sm:$0xff] %v628_v42  ;;  %543 = vst [vmem:[#allocation7 + $0x58] sm:$0xff] %v629_v43  ;;  %v354_v48 = vpop.f32.mrb[12].mxu0  ;;  %v427_v49 = vpop.f32.mrb[12].mxu1 }
 0x135   :  { %v355_v50 = vadd.f32 %v354_v48, %v832_v44  ;;  %v428_v51 = vadd.f32 %v427_v49, %v834_v45  ;;  %v356_v52 = vpop.f32.mrb[13].mxu0  ;;  %v429_v53 = vpop.f32.mrb[13].mxu1 }
 0x136   :  { %v357_v54 = vadd.f32 %v356_v52, %v836_v46  ;;  %v430_v55 = vadd.f32 %v429_v53, %v838_v47  ;;  %v358_v56 = vpop.f32.mrb[14].mxu0  ;;  %v431_v57 = vpop.f32.mrb[14].mxu1 }
 0x137   :  { %v359_v58 = vadd.f32 %v358_v56, %v832_v44  ;;  %v432_v59 = vadd.f32 %v431_v57, %v834_v45  ;;  %v360_v60 = vpop.f32.mrb[15].mxu0  ;;  %v433_v61 = vpop.f32.mrb[15].mxu1 }
 0x138   :  { %v630_v62 = vpack.c.bf16 %v357_v54, %v355_v50  ;;  %v631_v63 = vpack.c.bf16 %v430_v55, %v428_v51  ;;  %v361_v0 = vadd.f32 %v360_v60, %v836_v46  ;;  %v434_v1 = vadd.f32 %v433_v61, %v838_v47 }
 0x13a   :  { %544 = vst [vmem:[#allocation7 + $0x60] sm:$0xff] %v630_v62  ;;  %545 = vst [vmem:[#allocation7 + $0x68] sm:$0xff] %v631_v63  ;;  %v632_v2 = vpack.c.bf16 %v361_v0, %v359_v58  ;;  %v633_v3 = vpack.c.bf16 %v434_v1, %v432_v59 }
 0x13c   :  { %546 = vst [vmem:[#allocation7 + $0x70] sm:$0xff] %v632_v2  ;;  %547 = vst [vmem:[#allocation7 + $0x78] sm:$0xff] %v633_v3 }
 0x13d   :  { %749 = shalt.err (!%p746_p6)
}
 0x13e   :  { %s750_s17 = scalar_lea.hbm %s890_s3, 2048 }
 0x13f   :  { %p751_p7 = scmp.ne.s32.totalorder %s890_s3, %s750_s17  ;;  %p754_p8 = scmp.lt.u32.totalorder %s750_s17, %s890_s3 }
 0x141   :  { %p756_p9 = pnand %p754_p8, %p751_p7 }
 0x143   :  { %759 = shalt.err (!%p756_p9)
}
 0x144   :  { %559 = dma.vmem_to_hbm [thread:$0]  %s554_s13, 2048, %s890_s3, [#allocation4], %s770_s0, %s770_s0, %s771_s9  }
 0x145   :  { %764 = dma.done.wait [#allocation4], 2048  }
 0x146   :  { %765 = vsyncadd [#allocation4], 4294965248 }
 0x147   :  { %563 = vsyncpa [#allocation3], 1 }
 0x148   :  { %564 = vsyncpa [#allocation6], 1 }
 0x149   :  { %565 = vsyncpa [#allocation4], 1 }

</bundles_post_ra>
